<compile_context>
chip_gen: v6e
topology: v6e:2x2x1
jax: 0.10.0
libtpu: 0.0.40
codegen_flags: <defaults>
</compile_context>

<pallas_src>
import math
import jax
import jax.numpy as jnp
from jax.experimental import pallas as pl
from jax.experimental.pallas import tpu as pltpu


def tgcn_kernel(text_ref, adj_ref, dep_ref, w_ref, b_ref, out_ref):
    # Block shapes (per grid step):
    #   text_ref: (1, L, F)      full text for this batch element
    #   adj_ref : (1, TI, L)     rows i0..i0+TI of adj
    #   dep_ref : (1, L, TI, F)  dep_embed[:, i0:i0+TI, :]  (indexed [j, i, f])
    #   w_ref   : (F, O), b_ref: (1, O), out_ref: (1, TI, O)
    text = text_ref[0]                 # (L, F)
    adj = adj_ref[0]                   # (TI, L), adj[i, j]
    dep = dep_ref[0]                   # (L, TI, F), dep[j, i, f]
    w = w_ref[...]                     # (F, O)
    bias = b_ref[...]                  # (1, O)

    # term1[i, f] = sum_j adj[i, j] * text[j, f]            (MXU, f32 accum)
    term1 = jnp.dot(adj, text, preferred_element_type=jnp.float32)   # (TI, F)

    # term2[i, f] = sum_j adj[i, j] * dep[j, i, f]
    # Small 2-D transpose of adj (XLU), then a VPU multiply with a vreg-wise
    # reduce over the leading (j) axis -- dep is consumed streaming, no
    # (L, L, F) / (L, L, O) temporaries are ever formed.
    adj_t = adj.T                                                     # (L, TI)
    term2 = jnp.sum(adj_t[:, :, None] * dep, axis=0)                  # (TI, F)

    agg = term1 + term2.astype(jnp.float32)                           # (TI, F)

    # out[i, o] = relu( (agg @ W)[i, o] + bias[o] )          (MXU, f32 accum)
    out = jnp.dot(agg.astype(w.dtype), w, preferred_element_type=jnp.float32)
    out = out + bias.astype(jnp.float32)
    out_ref[0] = jnp.maximum(out, 0.0).astype(out_ref.dtype)


def _pick_i_tile(L, F, itemsize, budget_bytes=4 << 20):
    """Largest i-tile TI (multiple of 8, dividing L) whose dep slice
    (L, TI, F) stays under ~4 MiB, so the double-buffered DMA fits easily in
    scoped VMEM on all generations (v5e 16 MiB default, v7x 64 MiB physical)."""
    if L % 8 != 0:
        return L  # full-dim block (small / toy L); satisfies the (8,128) rule.
    candidates = [d for d in range(8, L + 1, 8) if L % d == 0]
    fitting = [d for d in candidates if L * d * F * itemsize <= budget_bytes]
    return max(fitting) if fitting else min(candidates)


def type_graph_convolution(text, adj, dep_embed, weight, bias, *, i_tile=None):
    B, L, F = text.shape
    O = weight.shape[1]
    bias2d = bias.reshape(1, O)

    TI = i_tile if i_tile is not None else _pick_i_tile(
        L, F, dep_embed.dtype.itemsize)
    assert L % TI == 0, "i-tile must divide seq_len"
    NI = L // TI

    return pl.pallas_call(
        tgcn_kernel,
        out_shape=jax.ShapeDtypeStruct((B, L, O), text.dtype),
        grid_spec=pltpu.PrefetchScalarGridSpec(
            num_scalar_prefetch=0,
            grid=(B, NI),
            in_specs=[
                pl.BlockSpec((1, L, F), lambda b, it: (b, 0, 0)),
                pl.BlockSpec((1, TI, L), lambda b, it: (b, it, 0)),
                pl.BlockSpec((1, L, TI, F), lambda b, it: (b, 0, it, 0)),
                pl.BlockSpec((F, O), lambda b, it: (0, 0)),
                pl.BlockSpec((1, O), lambda b, it: (0, 0)),
            ],
            out_specs=pl.BlockSpec((1, TI, O), lambda b, it: (b, it, 0)),
        ),
        compiler_params=pltpu.CompilerParams(
            dimension_semantics=("parallel", "parallel")),
    )(text, adj, dep_embed, weight, bias2d)


def reference(text, adj, dep_embed, weight, bias):
    # Pure-JAX reference mirroring the PyTorch forward (no rewrite).
    val_sum = text[:, :, None, :] + dep_embed                       # (B,L,L,F)
    hidden = jnp.einsum("bjif,fo->bjio", val_sum.astype(jnp.float32),
                        weight.astype(jnp.float32))                 # (B,L,L,O)
    out = jnp.einsum("bij,bijo->bio", adj.astype(jnp.float32),
                     jnp.transpose(hidden, (0, 2, 1, 3)))
    out = out + bias.astype(jnp.float32)
    return jnp.maximum(out, 0.0).astype(text.dtype)


if __name__ == "__main__":
    # Small shapes consistent with the module: batch=2, seq_len=8, hidden=32.
    B, L = 2, 8
    in_features = 32
    out_features = 32   # must equal in_features (as in the PyTorch module)

    key = jax.random.PRNGKey(0)
    k_text, k_adj, k_dep, k_w, k_b = jax.random.split(key, 5)

    text = jax.random.normal(k_text, (B, L, in_features), dtype=jnp.float32)
    adj = (jax.random.uniform(k_adj, (B, L, L)) > 0.5).astype(jnp.float32)
    dep_embed = jax.random.normal(k_dep, (B, L, L, in_features),
                                  dtype=jnp.float32)

    # Deterministic init mimicking kaiming_uniform_(a=sqrt(5)) + uniform bias
    # (PyTorch fan_in for a (in, out) weight is weight.size(1) = out_features).
    fan_in = out_features
    bound_w = 1.0 / math.sqrt(fan_in)
    weight = jax.random.uniform(k_w, (in_features, out_features),
                                minval=-bound_w, maxval=bound_w,
                                dtype=jnp.float32)
    bound_b = 1.0 / math.sqrt(fan_in)
    bias = jax.random.uniform(k_b, (out_features,),
                              minval=-bound_b, maxval=bound_b,
                              dtype=jnp.float32)

    out = type_graph_convolution(text, adj, dep_embed, weight, bias)
    out = jax.block_until_ready(out)

    ref = jax.block_until_ready(reference(text, adj, dep_embed, weight, bias))
    assert out.shape == (B, L, out_features)
    assert jnp.allclose(out, ref, atol=1e-4, rtol=1e-4)

    print("KERNEL_OK")
</pallas_src>

<mosaic_0001>
module attributes {stable_mosaic.version = 11 : i64} {
  func.func @tgcn_kernel(%arg0: i32, %arg1: i32, %arg2: memref<1x8x32xf32, #tpu.memory_space<vmem>>, %arg3: memref<1x8x8xf32, #tpu.memory_space<vmem>>, %arg4: memref<1x8x8x32xf32, #tpu.memory_space<vmem>>, %arg5: memref<32x32xf32, #tpu.memory_space<vmem>>, %arg6: memref<1x32xf32, #tpu.memory_space<vmem>>, %arg7: memref<1x8x32xf32, #tpu.memory_space<vmem>>) attributes {dimension_semantics = [#tpu.dimension_semantics<parallel>, #tpu.dimension_semantics<parallel>], iteration_bounds = array<i64: 2, 1>, scalar_prefetch = 0 : i64, scratch_operands = 0 : i64, tpu.core_type = #tpu.core_type<tc>, window_params = [{transform_indices = @transform_0, window_bounds = array<i64: 1, 8, 32>}, {transform_indices = @transform_1, window_bounds = array<i64: 1, 8, 8>}, {transform_indices = @transform_2, window_bounds = array<i64: 1, 8, 8, 32>}, {pipeline_mode = #tpu.pipeline_mode<synchronous>, transform_indices = @transform_3, window_bounds = array<i64: 32, 32>}, {pipeline_mode = #tpu.pipeline_mode<synchronous>, transform_indices = @transform_4, window_bounds = array<i64: 1, 32>}, {transform_indices = @transform_5, window_bounds = array<i64: 1, 8, 32>}]} {
    %c0 = arith.constant 0 : index
    %c0_0 = arith.constant 0 : index
    %c0_1 = arith.constant 0 : index
    %0 = vector.load %arg2[%c0, %c0_0, %c0_1] : memref<1x8x32xf32, #tpu.memory_space<vmem>>, vector<1x8x32xf32>
    %1 = vector.shape_cast %0 : vector<1x8x32xf32> to vector<8x32xf32>
    %c0_2 = arith.constant 0 : index
    %c0_3 = arith.constant 0 : index
    %c0_4 = arith.constant 0 : index
    %2 = vector.load %arg3[%c0_2, %c0_3, %c0_4] : memref<1x8x8xf32, #tpu.memory_space<vmem>>, vector<1x8x8xf32>
    %3 = vector.shape_cast %2 : vector<1x8x8xf32> to vector<8x8xf32>
    %c0_5 = arith.constant 0 : index
    %c0_6 = arith.constant 0 : index
    %c0_7 = arith.constant 0 : index
    %c0_8 = arith.constant 0 : index
    %4 = vector.load %arg4[%c0_5, %c0_6, %c0_7, %c0_8] : memref<1x8x8x32xf32, #tpu.memory_space<vmem>>, vector<1x8x8x32xf32>
    %5 = vector.shape_cast %4 : vector<1x8x8x32xf32> to vector<8x8x32xf32>
    %c0_9 = arith.constant 0 : index
    %c0_10 = arith.constant 0 : index
    %6 = vector.load %arg5[%c0_9, %c0_10] : memref<32x32xf32, #tpu.memory_space<vmem>>, vector<32x32xf32>
    %c0_11 = arith.constant 0 : index
    %c0_12 = arith.constant 0 : index
    %7 = vector.load %arg6[%c0_11, %c0_12] : memref<1x32xf32, #tpu.memory_space<vmem>>, vector<1x32xf32>
    %cst = arith.constant dense<0.000000e+00> : vector<8x32xf32>
    %8 = tpu.matmul %3, %1, %cst {dimension_numbers = #tpu.dot_dimension_numbers<[1], [0], [0], [1], [0, 0, 1, 1], [], []>} : vector<8x8xf32>, vector<8x32xf32>, vector<8x32xf32> -> vector<8x32xf32>
    %9 = tpu.transpose %3, [1, 0] : vector<8x8xf32> -> vector<8x8xf32>
    %10 = vector.shape_cast %9 : vector<8x8xf32> to vector<8x8x1xf32>
    %11 = vector.broadcast %10 : vector<8x8x1xf32> to vector<8x8x32xf32>
    %12 = arith.mulf %11, %5 : vector<8x8x32xf32>
    %cst_13 = arith.constant dense<0.000000e+00> : vector<8x32xf32>
    %13 = vector.multi_reduction <add>, %12, %cst_13 [0] : vector<8x8x32xf32> to vector<8x32xf32>
    %14 = arith.addf %8, %13 : vector<8x32xf32>
    %cst_14 = arith.constant dense<0.000000e+00> : vector<8x32xf32>
    %15 = tpu.matmul %14, %6, %cst_14 {dimension_numbers = #tpu.dot_dimension_numbers<[1], [0], [0], [1], [0, 0, 1, 1], [], []>} : vector<8x32xf32>, vector<32x32xf32>, vector<8x32xf32> -> vector<8x32xf32>
    %16 = vector.broadcast %7 : vector<1x32xf32> to vector<8x32xf32>
    %17 = arith.addf %15, %16 : vector<8x32xf32>
    %cst_15 = arith.constant 0.000000e+00 : f32
    %18 = vector.broadcast %cst_15 : f32 to vector<8x32xf32>
    %19 = arith.maximumf %17, %18 : vector<8x32xf32>
    %c0_16 = arith.constant 0 : index
    %c0_17 = arith.constant 0 : index
    %c0_18 = arith.constant 0 : index
    %20 = vector.load %arg7[%c0_16, %c0_17, %c0_18] : memref<1x8x32xf32, #tpu.memory_space<vmem>>, vector<1x8x32xf32>
    %21 = vector.shape_cast %20 : vector<1x8x32xf32> to vector<8x32xf32>
    %22 = vector.shape_cast %19 : vector<8x32xf32> to vector<1x8x32xf32>
    tpu.vector_store %arg7[%c0_16, %c0_17, %c0_18], %22 {strides = array<i32>} : memref<1x8x32xf32, #tpu.memory_space<vmem>>, vector<1x8x32xf32>,
    return
  }
  func.func @transform_0(%arg0: i32, %arg1: i32) -> (i32, i32, i32) {
    %c0_i32 = arith.constant 0 : i32
    %c0_i32_0 = arith.constant 0 : i32
    %c0_i32_1 = arith.constant 0 : i32
    return %arg0, %c0_i32, %c0_i32_0 : i32, i32, i32
  }
  func.func @transform_1(%arg0: i32, %arg1: i32) -> (i32, i32, i32) {
    %c0_i32 = arith.constant 0 : i32
    %c0_i32_0 = arith.constant 0 : i32
    return %arg0, %arg1, %c0_i32 : i32, i32, i32
  }
  func.func @transform_2(%arg0: i32, %arg1: i32) -> (i32, i32, i32, i32) {
    %c0_i32 = arith.constant 0 : i32
    %c0_i32_0 = arith.constant 0 : i32
    %c0_i32_1 = arith.constant 0 : i32
    return %arg0, %c0_i32, %arg1, %c0_i32_0 : i32, i32, i32, i32
  }
  func.func @transform_3(%arg0: i32, %arg1: i32) -> (i32, i32) {
    %c0_i32 = arith.constant 0 : i32
    %c0_i32_0 = arith.constant 0 : i32
    %c0_i32_1 = arith.constant 0 : i32
    return %c0_i32, %c0_i32_0 : i32, i32
  }
  func.func @transform_4(%arg0: i32, %arg1: i32) -> (i32, i32) {
    %c0_i32 = arith.constant 0 : i32
    %c0_i32_0 = arith.constant 0 : i32
    %c0_i32_1 = arith.constant 0 : i32
    return %c0_i32, %c0_i32_0 : i32, i32
  }
  func.func @transform_5(%arg0: i32, %arg1: i32) -> (i32, i32, i32) {
    %c0_i32 = arith.constant 0 : i32
    %c0_i32_0 = arith.constant 0 : i32
    return %arg0, %arg1, %c0_i32 : i32, i32, i32
  }
}

</mosaic_0001>

<bundles_post_ra>
// kernel: tpu_custom_call.1
= control target key start
LH: loop header
LB: loop body
LE: loop exit
PB: predicated region body
PF: predicated region fallthrough
CT: control target
= control target key end

     0   :  { %s1412_s0 = inlined_call_operand.hbm [shape: f32[2,8,32], index: 0, kind: input, shape index: {}]   ;;  %s1413_s1 = inlined_call_operand.hbm [shape: f32[2,8,8], index: 1, kind: input, shape index: {}]   ;;  %s1414_s2 = inlined_call_operand.hbm [shape: f32[2,8,8,32], index: 2, kind: input, shape index: {}]   ;;  %s1415_s3 = inlined_call_operand.hbm [shape: f32[32,32], index: 3, kind: input, shape index: {}]   ;;  %s1416_s4 = inlined_call_operand.vmem [shape: f32[1,32], index: 4, kind: input, shape index: {}]   ;;  %s1417_s5 = inlined_call_operand.hbm [shape: f32[2,8,32], index: 5, kind: output, shape index: {}]  }
   0x1   :  { %1422 = sst [smem:[#allocation18_spill]] %s1412_s0 }
   0x2   :  { %1423 = sst [smem:[#allocation19_spill]] %s1413_s1 }
   0x3   :  { %10 = vsyncpa [#allocation3], 0 }
   0x4   :  { %12 = vsyncpa [#allocation3 + $0x1], 0 }
   0x5   :  { %13 = vsyncpa [#allocation6], 0 }
   0x6   :  { %15 = vsyncpa [#allocation6 + $0x1], 0 }
   0x7   :  { %16 = vsyncpa [#allocation9], 0 }
   0x8   :  { %17 = vsyncpa [#allocation4], 0 }
   0x9   :  { %19 = vsyncpa [#allocation4 + $0x1], 0  ;;  %s1156_s18 = smov 0   ;;  %s1158_s19 = smov 0  }
   0xa   :  { %s1160_s20 = smov 0   ;;  %s1162_s21 = smov 0  }
   0xb   :  { %s1164_s22 = smov 0   ;;  %s1166_s23 = smov 0  }
   0xc LB: > { %1424 = sst [smem:[#allocation15_spill]] %s1103_s20  ;;  %s37_s24 = sadd.s32 1, %s1111_s22  ;;  %s1115_s23 = sphi %s1166_s23, %s25_s23   ;;  %s1111_s22 = sphi %s1164_s22, %s1447_s22   ;;  %s1107_s21 = sphi %s1162_s21, %s1446_s21   ;;  %s1103_s20 = sphi %s1160_s20, %s1442_s20   ;;  %s1099_s19 = sphi %s1158_s19, %s1445_s19   ;;  %s1095_s18 = sphi %s1156_s18, %s1444_s18  }
   0xd   : > { %s44_s25 = sadd.s32 1, %s1103_s20  ;;  %p39_p0 = scmp.ge.s32.totalorder %s37_s24, 2 }
   0xe   : > { %p51_p1 = scmp.ne.s32.totalorder %s1103_s20, %s1099_s19  ;;  %p52_p2 = scmp.eq.s32.totalorder %s1115_s23, 0 }
   0xf   : > { %s1449_s24 = smov (%p39_p0, %s37_s24), 0  ;;  %p861_p5 = scmp.lt.s32.totalorder %s1115_s23, 2 }
  0x10   : > { %1425 = sst [smem:[#allocation16_spill]] %s1449_s24  ;;  %p53_p4 = por %p52_p2, %p51_p1 }
  0x11   : > { %s41_s26 = ssub.s32 %s1111_s22, %s1449_s24  ;;  %s1201_s27 = sand.u32 1, %s1103_s20  }
  0x12   : > { %p42_p6 = scmp.eq.s32.totalorder %s41_s26, 0  ;;  %s786_s28 = sshll.u32 %s1201_s27, 3 }
  0x13   : > { %s787_s29 = sshll.u32 %s1111_s22, 7  ;;  %p1205_p7 = pnand %p861_p5, %p53_p4 }
  0x14   : > { %s1210_s6 = scalar_select %p42_p6, %s1103_s20, %s44_s25  }
  0x15   : > { %s241_s7 = sand.u32 1, %s1115_s23   ;;  %s1428_s1 = sld [smem:[#allocation19_spill]] }
  0x16   : > { %1427 = sst [smem:[#allocation17_spill]] %s1210_s6  ;;  %s245_s11 = scalar_lea.vmem [#allocation5], %s786_s28 }
  0x17   : > { %s253_s12 = sshll.u32 %s245_s11, 4  ;;  %s790_s13 = sshll.u32 %s1201_s27, 6  ;;  %s254_s12 = int_to_ptr.vmem [resolvable:$true] %s253_s12 }
  0x18   : > { %s1221_s14 = scalar_lea.sflag [#allocation6], %s241_s7  ;;  %p1420_p8 = pneg %p1205_p7 }
  0x19   : > { %s930_s15 = scalar_lea.vmem %s254_s12, 128  ;;  %s1117_s16 = smov [#allocation5]  }
  0x1a   : > { %p931_p9 = scmp.ne.s32.totalorder %s254_s12, %s930_s15  ;;  %s935_s17 = sshll.u32 %s1117_s16, 4  ;;  %s936_s17 = int_to_ptr.vmem [resolvable:$false] %s935_s17 }
  0x1b   : > { %s251_s10 = scalar_lea.hbm %s1428_s1, %s787_s29  ;;  %s937_s25 = scalar_lea.vmem %s936_s17, 256 }
  0x1c   : > { %p933_p10 = pnand %p931_p9, %p1420_p8  ;;  %p938_p12 = scmp.lt.s32.totalorder %s254_s12, %s936_s17 }
  0x1d   : > { %p939_p13 = scmp.lt.s32.totalorder %s937_s25, %s930_s15 }
  0x1e   : > { %p934_p11 = pneg %p933_p10 }
  0x1f   : > { %p940_p0 = por %p939_p13, %p938_p12 }
  0x21   : > { %p941_p2 = pnand %p940_p0, %p934_p11 }
  0x23   : > { %944 = shalt.err (!%p941_p2)
}
  0x24   : > { %852 = dma.hbm_to_vmem [thread:$0]  (!%p1205_p7), %s251_s10, 128, %s254_s12, %s1221_s14  }
  0x25   : > { %s264_s26 = scalar_lea.vmem [#allocation7], %s790_s13  ;;  %s1234_s8 = sadd.s32 4294967295, %s1115_s23  }
  0x26   : > { %s272_s7 = sshll.u32 %s264_s26, 4  ;;  %s782_s9 = sadd.s32 4294967294, %s1115_s23   ;;  %s1231_s7 = int_to_ptr.vmem [resolvable:$true] %s272_s7 }
  0x27   : > { %p57_p4 = scmp.ne.s32.totalorder %s1099_s19, %s1095_s18  ;;  %p1419_p5 = scmp.eq.s32.totalorder %s1234_s8, 0 }
  0x28   : > { %p181_p6 = scmp.eq.s32.totalorder %s1234_s8, 1  ;;  %p187_p9 = scmp.eq.s32.totalorder %s782_s9, 1 }
  0x29   : > { %p783_p10 = scmp.ge.s32.totalorder %s1115_s23, 1  ;;  %p1244_p11 = por %p1419_p5, %p57_p4 }
  0x2a   : > { %p1251_p12 = por %p181_p6, %p51_p1  ;;  %p1255_p13 = por %p187_p9, %p57_p4 }
  0x2b   : > { %p194_p0 = scmp.lt.s32.totalorder %s1115_s23, 3  ;;  %s1118_s15 = smov [#allocation8]  }
  0x2c   : > { %s206_s16 = sshll.u32 %s1118_s15, 4  ;;  %s1434_s0 = sld [smem:[#allocation18_spill]]  ;;  %s207_s16 = int_to_ptr.vmem [resolvable:$true] %s206_s16 }
  0x2d   : > { %p1260_p2 = pnand %p783_p10, %p194_p0  ;;  %s227_s1 = scalar_lea.vmem [#allocation2], %s786_s28 }
  0x2e   : > { %s234_s24 = sshll.u32 %s227_s1, 4  ;;  %s956_s15 = scalar_lea.vmem %s207_s16, 512  ;;  %s1282_s24 = int_to_ptr.vmem [resolvable:$true] %s234_s24 }
  0x2f   : > { %p842_p3 = pneg %p1260_p2  ;;  %p964_p10 = scmp.lt.s32.totalorder %s207_s16, %s207_s16 }
  0x30   : > { %p965_p0 = scmp.lt.s32.totalorder %s956_s15, %s956_s15 }
  0x31   : > { %p1268_p1 = pnand %p842_p3, %p1419_p5  ;;  %p957_p3 = scmp.ne.s32.totalorder %s207_s16, %s956_s15 }
  0x32   : > { %s1277_s9 = scalar_lea.hbm %s1434_s0, %s787_s29  ;;  %p966_p5 = por %p965_p0, %p964_p10 }
  0x33   : > { %p947_p4 = pneg %p1268_p1 }
  0x35   : > { %p959_p6 = pnand %p957_p3, %p947_p4 }
  0x37   : > { %p960_p9 = pneg %p959_p6 }
  0x39   : > { %p967_p8 = pnand %p966_p5, %p960_p9 }
  0x3b   : > { %970 = shalt.err (!%p967_p8)
}
  0x3c   : > { %s1119_s25 = smov 128   ;;  %s1120_s1 = smov 8  }
  0x3d   : > { %845 = dma.hbm_to_vmem [thread:$0]  (!%p1268_p1), %s1415_s3, 512, %s207_s16, [#allocation9], %s1119_s25, %s1119_s25, %s1120_s1  }
  0x3e   : > { %s224_s26 = scalar_lea.sflag [#allocation3], %s1201_s27  ;;  %s984_s15 = scalar_lea.vmem %s1282_s24, 128 }
  0x3f   : > { %p985_p5 = scmp.ne.s32.totalorder %s1282_s24, %s984_s15  ;;  %p1435_p8 = pneg %p1205_p7 }
  0x40   : > { %s1121_s6 = smov [#allocation2]  }
  0x41   : > { %p987_p4 = pnand %p985_p5, %p1435_p8  ;;  %s989_s0 = sshll.u32 %s1121_s6, 4  ;;  %s990_s0 = int_to_ptr.vmem [resolvable:$false] %s989_s0 }
  0x42   : > { %s991_s20 = scalar_lea.vmem %s990_s0, 256  ;;  %p992_p6 = scmp.lt.s32.totalorder %s1282_s24, %s990_s0 }
  0x43   : > { %p988_p3 = pneg %p987_p4  ;;  %p993_p9 = scmp.lt.s32.totalorder %s991_s20, %s984_s15 }
  0x45   : > { %p994_p10 = por %p993_p9, %p992_p6 }
  0x47   : > { %p995_p0 = pnand %p994_p10, %p988_p3 }
  0x49   : > { %998 = shalt.err (!%p995_p0)
}
  0x4a   : > { %849 = dma.hbm_to_vmem [thread:$0]  (!%p1205_p7), %s1277_s9, 128, %s1282_s24, %s224_s26  }
  0x4b   : > { %s1436_s27 = sshll.u32 %s1111_s22, 10  ;;  %s1012_s0 = scalar_lea.vmem %s1231_s7, 1024 }
  0x4c   : > { %s271_s17 = scalar_lea.hbm %s1414_s2, %s1436_s27  ;;  %p1013_p1 = scmp.ne.s32.totalorder %s1231_s7, %s1012_s0 }
  0x4d   : > { %p1437_p5 = pmov %p1435_p8  ;;  %s1122_s20 = smov [#allocation7]  }
  0x4e   : > { %s1017_s28 = sshll.u32 %s1122_s20, 4  ;;  %s1018_s28 = int_to_ptr.vmem [resolvable:$false] %s1017_s28 }
  0x4f   : > { %p1015_p8 = pnand %p1013_p1, %p1437_p5  ;;  %s1019_s29 = scalar_lea.vmem %s1018_s28, 2048 }
  0x50   : > { %p1020_p3 = scmp.lt.s32.totalorder %s1231_s7, %s1018_s28  ;;  %p1021_p6 = scmp.lt.s32.totalorder %s1019_s29, %s1012_s0 }
  0x51   : > { %p1016_p4 = pneg %p1015_p8 }
  0x52   : > { %p1022_p9 = por %p1021_p6, %p1020_p3 }
  0x54   : > { %p1023_p10 = pnand %p1022_p9, %p1016_p4 }
  0x56   : > { %1026 = shalt.err (!%p1023_p10)
}
  0x57   : > { %855 = dma.hbm_to_vmem [thread:$0]  (!%p1205_p7), %s271_s17, 1024, %s1231_s7, %s1221_s14, %s1119_s25, %s1119_s25, %s1120_s1  }
  0x58   : > { %284 = sbr.rel (%p1260_p2) target bundleno = 586 (0x24a), region = 40  ;;  %s1326_s24 = sand.u32 (!%p1260_p2), 1, %s1099_s19  }
  0x59   : > { %s1329_s9 = sshll.u32 (!%p1260_p2), %s1326_s24, 3  ;;  %s287_s26 = scalar_lea.sflag (!%p1260_p2), [#allocation3], %s1326_s24 }
  0x5a   : > { %s290_s30 = scalar_lea.vmem (!%p1260_p2), [#allocation2], %s1329_s9 }
  0x5d   : > { %1078 = dma.done.wait (%p1244_p11), %s287_s26, 128  }
  0x5e   : > { %1080 = vsyncadd (%p1244_p11), %s287_s26, 4294967168  ;;  %s295_s14 = sand.u32 1, %s1234_s8   ;;  %s299_s13 = scalar_lea.vmem [#allocation5], %s1329_s9 }
  0x5f   : > { %s296_s7 = scalar_lea.sflag [#allocation6], %s295_s14 }
  0x60   : > { %1082 = dma.done.wait (%p1244_p11), %s296_s7, 1152  }
  0x61   : > { %1084 = vsyncadd (%p1244_p11), %s296_s7, 4294966144  ;;  %s796_s25 = sshll.u32 %s1326_s24, 6  ;;  %p1438_p7 = scmp.eq.s32.totalorder %s1234_s8, 0 }
  0x62   : > { %s1344_s1 = scalar_lea.vmem [#allocation7], %s796_s25 }
  0x63   : > { %1086 = dma.done.wait (%p1438_p7), [#allocation9], 512   ;;  %p1439_p2 = pmov %p1438_p7 }
  0x64   : > { %v1123_v0 = vmov 0.0   ;;  %vm1124_vm0 = vmmov 0   ;;  %vm476_vm1 = vcmask 64512   ;;  %v350_v1 = vld [vmem:[%s299_s13] sm:$0xff]  ;;  %v349_v2 = vld [vmem:[%s290_s30] sm:$0xff]  ;;  %v396_v3 = vlaneseq  ;;  %s803_s15 = sshll.u32 %s1107_s21, 7 }
  0x65   : > { %1088 = vsyncadd (%p1439_p2), [#allocation9], 4294966784  ;;  %814 = vmatprep.subr.mxu0 %v1123_v0  ;;  %816 = vmatprep.mubr.msk.f32.mxu0 %vm1124_vm0, %v1123_v0  ;;  %v362_v17 = vld [vmem:[#allocation8 + $0x18] sm:$0xff]  ;;  %v361_v18 = vld [vmem:[#allocation8 + $0x10] sm:$0xff]  ;;  %vm460_vm2 = vcmask 261120   ;;  %s348_s27 = scalar_lea.vmem [#allocation10], %s1329_s9  ;;  %s644_s0 = scalar_lea.hbm %s1417_s5, %s803_s15 }
  0x66   : > { %819 = vmatprep.subr.mxu1 %v1123_v0  ;;  %827 = vmatprep.mubr.msk.f32.mxu1 %vm1124_vm0, %v1123_v0  ;;  %v397_v4 = vshrl.u32 %v396_v3, 7  ;;  %v360_v21 = vld [vmem:[#allocation8 + $0x8] sm:$0xff]  ;;  %v359_v22 = vld [vmem:[#allocation8] sm:$0xff]  ;;  %v353_v33 = vld [vmem:[%s1344_s1 + $0x10] sm:$0xff]  ;;  %s646_s16 = sshll.u32 %s348_s27, 4  ;;  %s632_s20 = scalar_lea.sflag [#allocation4], %s1326_s24  ;;  %s647_s16 = int_to_ptr.vmem [resolvable:$true] %s646_s16 }
  0x67   : > { %364 = vxpose.xlu0.b32.start.end [1/1] (short) (narrow) %v350_v1, 8  ;;  %815 = vmatpush3.msra.mxu0 %v349_v2  ;;  %v352_v30 = vld [vmem:[%s1344_s1 + $0x8] sm:$0xff]  ;;  %v351_v31 = vld [vmem:[%s1344_s1] sm:$0xff]  ;;  %v354_v37 = vld [vmem:[%s1344_s1 + $0x18] sm:$0xff]  ;;  %s1027_s28 = scalar_lea.vmem %s647_s16, 128  ;;  %s1125_s29 = smov [#allocation10]  }
  0x68   : > { %817 = vmatmul.mubr.msk.f32.vlgmr.msra.gmra.mxu0 %vm476_vm1, %v350_v1  ;;  %v405_v5 = vsub.s32 1, %v397_v4  ;;  %v398_v6 = vsub.s32 0, %v397_v4  ;;  %v412_v10 = vsub.s32 2, %v397_v4  ;;  %v419_v12 = vsub.s32 3, %v397_v4  ;;  %820 = vmatpush3.msra.mxu1 %v362_v17  ;;  %v355_v39 = vld [vmem:[%s1344_s1 + $0x20] sm:$0xff]  ;;  %v356_v44 = vld [vmem:[%s1344_s1 + $0x28] sm:$0xff]  ;;  %p1028_p11 = scmp.ne.s32.totalorder %s647_s16, %s1027_s28 }
  0x69   : > { %v426_v14 = vsub.s32 4, %v397_v4  ;;  %v433_v16 = vsub.s32 5, %v397_v4  ;;  %821 = vmatprep.subr.mxu1 %v1123_v0  ;;  %v440_v20 = vsub.s32 6, %v397_v4  ;;  %v447_v24 = vsub.s32 7, %v397_v4  ;;  %v357_v52 = vld [vmem:[%s1344_s1 + $0x30] sm:$0xff]  ;;  %v358_v59 = vld [vmem:[%s1344_s1 + $0x38] sm:$0xff] }
  0x6a   : > { %822 = vmatpush3.msra.mxu1 %v361_v18  ;;  %v800_v4 = vld [vmem:[%s1416_s4] ss:$0 sm:$0xff]  ;;  %p1029_p0 = pnand %p1028_p11, %p1251_p12  ;;  %s1031_s21 = sshll.u32 %s1125_s29, 4  ;;  %s1032_s21 = int_to_ptr.vmem [resolvable:$false] %s1031_s21 }
  0x6b   : > { %823 = vmatprep.subr.mxu1 %v1123_v0  ;;  %s1033_s9 = scalar_lea.vmem %s1032_s21, 256  ;;  %p1034_p5 = scmp.lt.s32.totalorder %s647_s16, %s1032_s21 }
  0x6c   : > { %824 = vmatpush3.msra.mxu1 %v360_v21  ;;  %p1030_p1 = pneg %p1029_p0  ;;  %p1035_p8 = scmp.lt.s32.totalorder %s1033_s9, %s1027_s28 }
  0x6d   : > { %825 = vmatprep.subr.mxu1 %v1123_v0 }
  0x6e   : > { %826 = vmatpush3.msra.mxu1 %v359_v22  ;;  %p1036_p4 = por %p1035_p8, %p1034_p5 }
  0x70   : > { %p1037_p3 = pnand %p1036_p4, %p1030_p1 }
  0xe3   : > { %v380_v7 = vpop.trf.xlu0 }
  0xe4   : > { %v406_v8 = vrot.slane %v380_v7, %v405_v5  ;;  %v399_v9 = vrot.slane %v380_v7, %v398_v6  ;;  %v413_v11 = vrot.slane %v380_v7, %v412_v10  ;;  %v420_v13 = vrot.slane %v380_v7, %v419_v12 }
  0xe5   : > { %v427_v15 = vrot.slane %v380_v7, %v426_v14  ;;  %v434_v19 = vrot.slane %v380_v7, %v433_v16  ;;  %v441_v23 = vrot.slane %v380_v7, %v440_v20  ;;  %v448_v25 = vrot.slane %v380_v7, %v447_v24 }
  0xe6   : > { %408 = vbcast.lane.b32.xlu1 %v406_v8, 256  ;;  %401 = vbcast.lane.b32.xlu0 %v399_v9, 256 }
  0xea   : > { %415 = vbcast.lane.b32.xlu1 %v413_v11, 256 }
  0xee   : > { %422 = vbcast.lane.b32.xlu1 %v420_v13, 256 }
  0xf2   : > { %429 = vbcast.lane.b32.xlu1 %v427_v15, 256 }
  0xf6   : > { %436 = vbcast.lane.b32.xlu1 %v434_v19, 256 }
  0xfa   : > { %443 = vbcast.lane.b32.xlu1 %v441_v23, 256 }
  0xfe   : > { %450 = vbcast.lane.b32.xlu1 %v448_v25, 256 }
 0x128   : > { %v546_v26 = vpop.f32.mrf.mxu0 }
 0x12a   : > { %v818_v27 = vpop.f32.mrf.mxu0 }
 0x158   : > { %v409_v28 = vpop.permute.xlu1 %408  ;;  %v402_v32 = vpop.permute.xlu0 %401 }
 0x159   : > { %v453_v35 = vmul.f32 %v409_v28, %v352_v30  ;;  %v452_v36 = vmul.f32 %v402_v32, %v351_v31 }
 0x15b   : > { %v462_v41 = vsel %vm460_vm2, %v453_v35, 0.0  ;;  %v461_v42 = vsel %vm460_vm2, %v452_v36, 0.0 }
 0x15c   : > { %v416_v29 = vpop.permute.xlu1 %415  ;;  %v463_v47 = vadd.f32 %v462_v41, %v461_v42 }
 0x15d   : > { %v454_v38 = vmul.f32 %v416_v29, %v353_v33 }
 0x15f   : > { %v464_v45 = vsel %vm460_vm2, %v454_v38, 0.0 }
 0x160   : > { %v423_v34 = vpop.permute.xlu1 %422  ;;  %v465_v51 = vadd.f32 %v464_v45, %v463_v47 }
 0x161   : > { %v455_v43 = vmul.f32 %v423_v34, %v354_v37 }
 0x163   : > { %v466_v49 = vsel %vm460_vm2, %v455_v43, 0.0 }
 0x164   : > { %v430_v40 = vpop.permute.xlu1 %429  ;;  %v467_v54 = vadd.f32 %v466_v49, %v465_v51 }
 0x165   : > { %v456_v46 = vmul.f32 %v430_v40, %v355_v39 }
 0x167   : > { %v468_v53 = vsel %vm460_vm2, %v456_v46, 0.0 }
 0x168   : > { %v437_v48 = vpop.permute.xlu1 %436  ;;  %v469_v58 = vadd.f32 %v468_v53, %v467_v54 }
 0x169   : > { %v457_v50 = vmul.f32 %v437_v48, %v356_v44 }
 0x16b   : > { %v470_v56 = vsel %vm460_vm2, %v457_v50, 0.0 }
 0x16c   : > { %v444_v55 = vpop.permute.xlu1 %443  ;;  %v471_v61 = vadd.f32 %v470_v56, %v469_v58 }
 0x16d   : > { %v458_v57 = vmul.f32 %v444_v55, %v357_v52 }
 0x16f   : > { %v472_v60 = vsel %vm460_vm2, %v458_v57, 0.0 }
 0x170   : > { %v451_v62 = vpop.permute.xlu1 %450  ;;  %v473_v0 = vadd.f32 %v472_v60, %v471_v61 }
 0x171   : > { %v459_v63 = vmul.f32 %v451_v62, %v358_v59 }
 0x173   : > { %v474_v1 = vsel %vm460_vm2, %v459_v63, 0.0 }
 0x174   : > { %v475_v2 = vadd.f32 %v474_v1, %v473_v0 }
 0x176   : > { %v547_v3 = vadd.f32 %v546_v26, %v475_v2 }
 0x178   : > { %828 = vmatmul.mubr.msk.f32.vlgmr.msra.gmra.mxu1 %vm460_vm2, %v547_v3 }
 0x238   : > { %v625_v5 = vpop.f32.mrf.mxu1 }
 0x239   : > { %v626_v6 = vadd.f32 %v800_v4, %v625_v5 }
 0x23a   : > { %v829_v7 = vpop.f32.mrf.mxu1 }
 0x23b   : > { %v629_v8 = vmax.f32 %v626_v6, 0.0 }
 0x23d   : > { %630 = vst.msk [vmem:[%s348_s27] sm:$0xff] %vm460_vm2, %v629_v8 }
 0x23e   : > { %1040 = shalt.err (!%p1037_p3)
}
 0x23f   : > { %s1041_s26 = scalar_lea.hbm %s644_s0, 128  ;;  %s1045_s14 = scalar_lea.hbm %s1417_s5, 256 }
 0x240   : > { %p1042_p6 = scmp.ne.s32.totalorder %s644_s0, %s1041_s26  ;;  %p1046_p7 = scmp.lt.s32.totalorder %s644_s0, %s1417_s5 }
 0x241   : > { %p1047_p2 = scmp.lt.s32.totalorder %s1045_s14, %s1041_s26 }
 0x242   : > { %p1043_p9 = pnand %p1042_p6, %p1251_p12 }
 0x243   : > { %p1048_p11 = por %p1047_p2, %p1046_p7 }
 0x244   : > { %p1044_p10 = pneg %p1043_p9 }
 0x246   : > { %p1049_p0 = pnand %p1048_p11, %p1044_p10 }
 0x248   : > { %1052 = shalt.err (!%p1049_p0)
}
 0x249   : > { %840 = dma.vmem_to_hbm [thread:$0]  (%p1251_p12), %s647_s16, 128, %s644_s0, %s632_s20  }
 0x24a PF: > { %s658_s25 = sand.u32 1, %s1095_s18   ;;  %p1440_p1 = scmp.ge.s32.totalorder %s1115_s23, 2 }
 0x24b   : > { %s659_s1 = scalar_lea.sflag [#allocation4], %s658_s25 }
 0x24c   : > { %p857_p5 = pnand %p1440_p1, %p1255_p13 }
 0x24e   : > { %p858_p8 = pneg %p857_p5 }
 0x250   : > { %1090 = dma.done.wait (%p858_p8), %s659_s1, 128  }
 0x251   : > { %1092 = vsyncadd (%p858_p8), %s659_s1, 4294967168  ;;  %s25_s23 = sadd.s32 1, %s1115_s23   ;;  %s1441_s8 = sld [smem:[#allocation15_spill]] }
 0x252   : > { %p22_p4 = scmp.ge.s32.totalorder %s25_s23, 4   ;;  %s1442_s20 = sld [smem:[#allocation17_spill]] }
 0x253   : > { %s1443_s11 = sld [smem:[#allocation16_spill]]  ;;  %s1444_s18 = smov %s1099_s19 }
 0x254   : > { %s1446_s21 = smov %s1111_s22 }
 0x255   :  { %24 = sbr.rel (!%p22_p4) target bundleno = 12 (0xc), region = 113 }
 0x257   : > { %s1445_s19 = smov %s1441_s8 }
 0x259   : > { %s1447_s22 = smov %s1443_s11 }
 0x25a   :  { %664 = vsyncpa [#allocation3], 1 }
 0x25b   :  { %666 = vsyncpa [#allocation3 + $0x1], 1 }
 0x25c   :  { %667 = vsyncpa [#allocation6], 1 }
 0x25d   :  { %669 = vsyncpa [#allocation6 + $0x1], 1 }
 0x25e   :  { %670 = vsyncpa [#allocation9], 1 }
 0x25f   :  { %671 = vsyncpa [#allocation4], 1 }
 0x260   :  { %673 = vsyncpa [#allocation4 + $0x1], 1 }

</bundles_post_ra>
